<compile_context>
chip_gen: v7x
topology: tpu7x:2x2x1
jax: 0.10.0
libtpu: 0.0.40
codegen_flags: <defaults>
</compile_context>

<pallas_src>
import functools

import jax
import jax.numpy as jnp
from jax import lax
from jax.experimental import pallas as pl
from jax.experimental.pallas import tpu as pltpu

_KEPS = 1e-8  # pytorch3d kEpsilon


def _plane_coeffs(face_verts):
    """Per-face affine plane coefficients for barycentrics and z.

    face_verts: (N, F, 3, 3) -- [face, vertex, (x, y, z)], x/y already flipped.
    Returns (N, 4F, 3) float32: rows [0:F)  -> w0 plane [A, B, C]
                                 [F:2F) -> w1 plane
                                 [2F:3F)-> w2 plane
                                 [3F:4F)-> z  plane
    such that plane(x, y) = A*x + B*y + C, with 1/denom folded in and
    degenerate (area == 0) faces replaced by planes that can never be inside.
    """
    v0, v1, v2 = face_verts[:, :, 0, :], face_verts[:, :, 1, :], face_verts[:, :, 2, :]
    x0, y0, z0 = v0[..., 0], v0[..., 1], v0[..., 2]
    x1, y1, z1 = v1[..., 0], v1[..., 1], v1[..., 2]
    x2, y2, z2 = v2[..., 0], v2[..., 1], v2[..., 2]

    # area = edge_function(v2, v0, v1)
    area = (x2 - x0) * (y1 - y0) - (y2 - y0) * (x1 - x0)
    denom = area + jnp.where(area >= 0.0, _KEPS, -_KEPS)
    inv = 1.0 / denom

    # edge(p, a, b) = px*(by-ay) - py*(bx-ax) + (ay*bx - ax*by)
    A0 = (y2 - y1) * inv
    B0 = -(x2 - x1) * inv
    C0 = (y1 * x2 - x1 * y2) * inv
    A1 = (y0 - y2) * inv
    B1 = -(x0 - x2) * inv
    C1 = (y2 * x0 - x2 * y0) * inv
    A2 = (y1 - y0) * inv
    B2 = -(x1 - x0) * inv
    C2 = (y0 * x1 - x0 * y1) * inv

    Az = A0 * z0 + A1 * z1 + A2 * z2
    Bz = B0 * z0 + B1 * z1 + B2 * z2
    Cz = C0 * z0 + C1 * z1 + C2 * z2

    deg = area == 0.0
    zero = jnp.zeros_like(A0)
    negone = jnp.full_like(A0, -1.0)

    def _mask_w(a, b, c):
        # degenerate face -> w == -1 everywhere -> never strictly inside
        return (jnp.where(deg, zero, a),
                jnp.where(deg, zero, b),
                jnp.where(deg, negone, c))

    A0, B0, C0 = _mask_w(A0, B0, C0)
    A1, B1, C1 = _mask_w(A1, B1, C1)
    A2, B2, C2 = _mask_w(A2, B2, C2)
    Az = jnp.where(deg, zero, Az)
    Bz = jnp.where(deg, zero, Bz)
    Cz = jnp.where(deg, zero, Cz)

    w0 = jnp.stack([A0, B0, C0], axis=-1)   # (N, F, 3)
    w1 = jnp.stack([A1, B1, C1], axis=-1)
    w2 = jnp.stack([A2, B2, C2], axis=-1)
    zp = jnp.stack([Az, Bz, Cz], axis=-1)
    return jnp.concatenate([w0, w1, w2, zp], axis=1).astype(jnp.float32)  # (N, 4F, 3)


def _raster_kernel(coef_ref, attr_ref, p_ref, out_ref, e_ref, w_ref, *, Fp):
    # coef_ref: (1, 4*Fp, 8)    per-face plane coefficients (K padded 3 -> 8)
    # attr_ref: (1, D+1, 4*Fp)  v-major attribute matrix + vis row/block
    # p_ref:    (8, thw)        pixel matrix rows [xf, yf, 1, 0...] (lane-dense)
    # out_ref:  (1, D+1, thw)   D interpolated channels + vismask
    # e_ref:    (4*Fp, thw)     VMEM scratch: all plane evaluations
    # w_ref:    (4*Fp, thw)     VMEM scratch: selection weights (+ vis block)
    thw = out_ref.shape[-1]

    # --- MXU #1: evaluate every barycentric / z plane at every pixel --------
    e_ref[...] = jnp.dot(coef_ref[0], p_ref[...],
                         preferred_element_type=jnp.float32)

    # --- slab-vectorized z-test / coverage over the whole face axis ---------
    w0s = e_ref[0 * Fp:1 * Fp, :]          # (Fp, thw) static aligned slices
    w1s = e_ref[1 * Fp:2 * Fp, :]
    w2s = e_ref[2 * Fp:3 * Fp, :]
    zs = e_ref[3 * Fp:4 * Fp, :]

    valid = (w0s > 0.0) & (w1s > 0.0) & (w2s > 0.0) & (zs >= 0.0)
    z_masked = jnp.where(valid, zs, jnp.inf)                      # (Fp, thw)
    best_z = jnp.min(z_masked, axis=0, keepdims=True)             # (1, thw), XLU

    face_iota = lax.broadcasted_iota(jnp.int32, (Fp, thw), 0)
    winner = valid & (z_masked == best_z)        # same masked-z as the min
    face_id = jnp.min(jnp.where(winner, face_iota, Fp),
                      axis=0, keepdims=True)     # int32; lowest index wins, Fp = none
    onehot = (face_iota == face_id).astype(jnp.float32)           # (Fp, thw)

    # --- selection weights: four dense slab stores (v-major layout) ---------
    w_ref[0 * Fp:1 * Fp, :] = onehot * w0s
    w_ref[1 * Fp:2 * Fp, :] = onehot * w1s
    w_ref[2 * Fp:3 * Fp, :] = onehot * w2s
    w_ref[3 * Fp:4 * Fp, :] = onehot                              # vis indicator

    # --- MXU #2: attrs + vismask emitted together, single lane-dense store --
    out_ref[0] = jnp.dot(attr_ref[0], w_ref[...],
                         preferred_element_type=jnp.float32).astype(out_ref.dtype)


def _choose_tile_hw(hw, fp, d, budget_bytes=16 << 20, max_tile=8192):
    """Largest lane-dense pixel tile (multiple of 128 dividing hw) whose VMEM
    footprint (e/w scratch + double-buffered P and output) fits budget_bytes."""
    if hw % 128 != 0:
        return hw                       # tiny/odd image: single full-extent tile
    # bytes per pixel lane: e_ref+w_ref (8*Fp f32) + 2x P (16 f32) + 2x out (2*(D+1) f32)
    per_lane = 4 * (8 * fp + 16 + 2 * (d + 1))
    cap = min(max_tile, hw, max(128, budget_bytes // per_lane))
    best = 128
    t = 256
    while t <= cap:
        if hw % t == 0:
            best = t
        t += 128
    return best


def pytorch3d_rasterizer_forward(vertices, faces, attributes, *, image_size=16):
    """vertices: (N, V, 3) f32 NDC; faces: (N, F, 3) int; attributes: (N, F, 3, D) f32.
       Returns (N, D+1, H, W) f32 (NCHW), matching Pytorch3dRasterizer.forward."""
    N = vertices.shape[0]
    F = faces.shape[1]
    D = attributes.shape[-1]
    H = W = int(image_size)
    HW = H * W

    # ---- glue (plain JAX): sign flip + per-face vertex gather --------------
    fixed = vertices.astype(jnp.float32)
    fixed = fixed.at[..., :2].multiply(-1.0)
    face_verts = jax.vmap(lambda v, fc: v[fc])(fixed, faces.astype(jnp.int32))  # (N,F,3,3)
    attrs_f = attributes.astype(jnp.float32)

    # pad faces to a multiple of 8 (zero faces are degenerate -> never hit)
    Fp = max(8, ((F + 7) // 8) * 8)
    pad_f = Fp - F
    if pad_f:
        face_verts = jnp.pad(face_verts, ((0, 0), (0, pad_f), (0, 0), (0, 0)))
        attrs_f = jnp.pad(attrs_f, ((0, 0), (0, pad_f), (0, 0), (0, 0)))

    # per-face plane coefficients, K padded 3 -> 8 for clean MXU feed
    coeffs = _plane_coeffs(face_verts)                       # (N, 4Fp, 3)
    coeffs = jnp.pad(coeffs, ((0, 0), (0, 0), (0, 5)))       # (N, 4Fp, 8)

    # augmented attribute matrix (N, D+1, 4Fp), v-major: column v*Fp + f holds
    # attrs[n, f, v, :] in rows 0..D-1; block [3Fp:4Fp) row D = 1 (vismask).
    attr_vmaj = attrs_f.transpose(0, 3, 2, 1).reshape(N, D, 3 * Fp)   # (N, D, 3Fp)
    attr_mat = jnp.concatenate(
        [attr_vmaj, jnp.zeros((N, D, Fp), jnp.float32)], axis=2)       # (N, D, 4Fp)
    vis_row = jnp.concatenate(
        [jnp.zeros((N, 1, 3 * Fp), jnp.float32),
         jnp.ones((N, 1, Fp), jnp.float32)], axis=2)                   # (N, 1, 4Fp)
    attr_aug = jnp.concatenate([attr_mat, vis_row], axis=1)            # (N, D+1, 4Fp)

    # lane-dense pixel matrix P = [xf; yf; 1; 0...] of shape (8, HW)
    ys = 1.0 - (2.0 * jnp.arange(H, dtype=jnp.float32) + 1.0) / float(H)
    xs = 1.0 - (2.0 * jnp.arange(W, dtype=jnp.float32) + 1.0) / float(W)
    yf = jnp.repeat(ys, W)          # pixel p = row*W + col
    xf = jnp.tile(xs, H)
    P = jnp.stack([xf, yf, jnp.ones_like(xf)], axis=0)       # (3, HW)
    P = jnp.pad(P, ((0, 5), (0, 0)))                         # (8, HW)

    # VMEM-aware lane-dense pixel tiling (safe on v5e/v6e/v7x)
    thw = _choose_tile_hw(HW, Fp, D)
    n_tiles = pl.cdiv(HW, thw)

    kernel = functools.partial(_raster_kernel, Fp=Fp)
    out_flat = pl.pallas_call(
        kernel,
        out_shape=jax.ShapeDtypeStruct((N, D + 1, HW), jnp.float32),
        grid_spec=pltpu.PrefetchScalarGridSpec(
            num_scalar_prefetch=0,
            # pixel tiles outer, batch inner: the P block index is constant
            # across the inner N axis, so it is DMA'd once per tile.
            grid=(n_tiles, N),
            in_specs=[
                pl.BlockSpec((1, 4 * Fp, 8), lambda t, n: (n, 0, 0)),
                pl.BlockSpec((1, D + 1, 4 * Fp), lambda t, n: (n, 0, 0)),
                pl.BlockSpec((8, thw), lambda t, n: (0, t)),
            ],
            out_specs=pl.BlockSpec((1, D + 1, thw), lambda t, n: (n, 0, t)),
            scratch_shapes=[
                pltpu.VMEM((4 * Fp, thw), jnp.float32),   # plane evaluations E
                pltpu.VMEM((4 * Fp, thw), jnp.float32),   # selection weights (+vis)
            ],
        ),
        compiler_params=pltpu.CompilerParams(
            dimension_semantics=("parallel", "parallel"),
            vmem_limit_bytes=32 * 1024 * 1024,
        ),
    )(coeffs, attr_aug, P)

    return out_flat.reshape(N, D + 1, H, W)


if __name__ == "__main__":
    # Small, deterministic synthetic inputs.
    # TODO(synk): bin_size / max_faces_per_bin are perf-only knobs of the CUDA
    # rasterizer (naive path reproduced here); per-tile face binning (scalar
    # prefetch) or face-chunked plane evaluation would be the TPU analogue for
    # very large meshes (bounds the (4Fp, thw) scratch on v7x's 64 MiB VMEM).
    # zbuf/dists/bary_coords are computed but unused by forward(), so not emitted.
    key = jax.random.PRNGKey(0)
    k_v, k_f, k_a = jax.random.split(key, 3)

    N, V, F, D, IMG = 2, 12, 8, 3, 16

    xy = jax.random.uniform(k_v, (N, V, 2), minval=-0.9, maxval=0.9)
    z = jax.random.uniform(k_v, (N, V, 1), minval=0.1, maxval=1.0)
    vertices = jnp.concatenate([xy, z], axis=-1).astype(jnp.float32)   # (N, V, 3)

    faces = jax.random.randint(k_f, (N, F, 3), 0, V, dtype=jnp.int32)  # (N, F, 3)
    attributes = jax.random.uniform(k_a, (N, F, 3, D), dtype=jnp.float32)

    out = pytorch3d_rasterizer_forward(vertices, faces, attributes, image_size=IMG)
    out = jax.block_until_ready(out)

    assert out.shape == (N, D + 1, IMG, IMG)
    assert bool(jnp.all(jnp.isfinite(out)))
    print("KERNEL_OK")
</pallas_src>

<mosaic_0001>
module attributes {stable_mosaic.version = 11 : i64} {
  func.func @_raster_kernel(%arg0: i32, %arg1: i32, %arg2: memref<1x32x8xf32, #tpu.memory_space<vmem>>, %arg3: memref<1x4x32xf32, #tpu.memory_space<vmem>>, %arg4: memref<8x256xf32, #tpu.memory_space<vmem>>, %arg5: memref<1x4x256xf32, #tpu.memory_space<vmem>>, %arg6: memref<32x256xf32, #tpu.memory_space<vmem>>, %arg7: memref<32x256xf32, #tpu.memory_space<vmem>>) attributes {dimension_semantics = [#tpu.dimension_semantics<parallel>, #tpu.dimension_semantics<parallel>], iteration_bounds = array<i64: 1, 2>, scalar_prefetch = 0 : i64, scratch_operands = 2 : i64, tpu.core_type = #tpu.core_type<tc>, window_params = [{transform_indices = @transform_0, window_bounds = array<i64: 1, 32, 8>}, {transform_indices = @transform_1, window_bounds = array<i64: 1, 4, 32>}, {transform_indices = @transform_2, window_bounds = array<i64: 8, 256>}, {transform_indices = @transform_3, window_bounds = array<i64: 1, 4, 256>}]} {
    %c0 = arith.constant 0 : index
    %c0_0 = arith.constant 0 : index
    %c0_1 = arith.constant 0 : index
    %0 = vector.load %arg2[%c0, %c0_0, %c0_1] : memref<1x32x8xf32, #tpu.memory_space<vmem>>, vector<1x32x8xf32>
    %1 = vector.shape_cast %0 : vector<1x32x8xf32> to vector<32x8xf32>
    %c0_2 = arith.constant 0 : index
    %c0_3 = arith.constant 0 : index
    %2 = vector.load %arg4[%c0_2, %c0_3] : memref<8x256xf32, #tpu.memory_space<vmem>>, vector<8x256xf32>
    %cst = arith.constant dense<0.000000e+00> : vector<32x256xf32>
    %3 = tpu.matmul %1, %2, %cst {dimension_numbers = #tpu.dot_dimension_numbers<[1], [0], [0], [1], [0, 0, 1, 1], [], []>} : vector<32x8xf32>, vector<8x256xf32>, vector<32x256xf32> -> vector<32x256xf32>
    %c0_4 = arith.constant 0 : index
    %c0_5 = arith.constant 0 : index
    %4 = vector.load %arg6[%c0_4, %c0_5] : memref<32x256xf32, #tpu.memory_space<vmem>>, vector<32x256xf32>
    tpu.vector_store %arg6[%c0_4, %c0_5], %3 {strides = array<i32>} : memref<32x256xf32, #tpu.memory_space<vmem>>, vector<32x256xf32>,
    %c0_6 = arith.constant 0 : index
    %c0_7 = arith.constant 0 : index
    %5 = vector.load %arg6[%c0_6, %c0_7] : memref<32x256xf32, #tpu.memory_space<vmem>>, vector<8x256xf32>
    %c8 = arith.constant 8 : index
    %c0_8 = arith.constant 0 : index
    %6 = vector.load %arg6[%c8, %c0_8] : memref<32x256xf32, #tpu.memory_space<vmem>>, vector<8x256xf32>
    %c16 = arith.constant 16 : index
    %c0_9 = arith.constant 0 : index
    %7 = vector.load %arg6[%c16, %c0_9] : memref<32x256xf32, #tpu.memory_space<vmem>>, vector<8x256xf32>
    %c24 = arith.constant 24 : index
    %c0_10 = arith.constant 0 : index
    %8 = vector.load %arg6[%c24, %c0_10] : memref<32x256xf32, #tpu.memory_space<vmem>>, vector<8x256xf32>
    %cst_11 = arith.constant 0.000000e+00 : f32
    %9 = vector.broadcast %cst_11 : f32 to vector<8x256xf32>
    %10 = arith.cmpf ogt, %5, %9 : vector<8x256xf32>
    %cst_12 = arith.constant 0.000000e+00 : f32
    %11 = vector.broadcast %cst_12 : f32 to vector<8x256xf32>
    %12 = arith.cmpf ogt, %6, %11 : vector<8x256xf32>
    %13 = arith.andi %10, %12 : vector<8x256xi1>
    %cst_13 = arith.constant 0.000000e+00 : f32
    %14 = vector.broadcast %cst_13 : f32 to vector<8x256xf32>
    %15 = arith.cmpf ogt, %7, %14 : vector<8x256xf32>
    %16 = arith.andi %13, %15 : vector<8x256xi1>
    %cst_14 = arith.constant 0.000000e+00 : f32
    %17 = vector.broadcast %cst_14 : f32 to vector<8x256xf32>
    %18 = arith.cmpf oge, %8, %17 : vector<8x256xf32>
    %19 = arith.andi %16, %18 : vector<8x256xi1>
    %cst_15 = arith.constant 0x7F800000 : f32
    %20 = vector.broadcast %cst_15 : f32 to vector<8x256xf32>
    %21 = arith.select %19, %8, %20 : vector<8x256xi1>, vector<8x256xf32>
    %cst_16 = arith.constant dense<0x7F800000> : vector<256xf32>
    %22 = vector.multi_reduction <minimumf>, %21, %cst_16 [0] : vector<8x256xf32> to vector<256xf32>
    %23 = vector.shape_cast %22 : vector<256xf32> to vector<1x256xf32>
    %24 = tpu.iota {dimensions = array<i32: 0>} : vector<8x256xi32>
    %25 = vector.broadcast %23 : vector<1x256xf32> to vector<8x256xf32>
    %26 = arith.cmpf oeq, %21, %25 : vector<8x256xf32>
    %27 = arith.andi %19, %26 : vector<8x256xi1>
    %c8_i32 = arith.constant 8 : i32
    %28 = vector.broadcast %c8_i32 : i32 to vector<8x256xi32>
    %29 = arith.select %27, %24, %28 : vector<8x256xi1>, vector<8x256xi32>
    %cst_17 = arith.constant dense<2147483647> : vector<256xi32>
    %30 = vector.multi_reduction <minsi>, %29, %cst_17 [0] : vector<8x256xi32> to vector<256xi32>
    %31 = vector.shape_cast %30 : vector<256xi32> to vector<1x256xi32>
    %32 = vector.broadcast %31 : vector<1x256xi32> to vector<8x256xi32>
    %33 = arith.cmpi eq, %24, %32 : vector<8x256xi32>
    %34 = arith.extui %33 : vector<8x256xi1> to vector<8x256xi32>
    %35 = arith.sitofp %34 : vector<8x256xi32> to vector<8x256xf32>
    %36 = arith.mulf %35, %5 : vector<8x256xf32>
    %c0_18 = arith.constant 0 : index
    %c0_19 = arith.constant 0 : index
    %37 = vector.load %arg7[%c0_18, %c0_19] : memref<32x256xf32, #tpu.memory_space<vmem>>, vector<8x256xf32>
    tpu.vector_store %arg7[%c0_18, %c0_19], %36 {strides = array<i32>} : memref<32x256xf32, #tpu.memory_space<vmem>>, vector<8x256xf32>,
    %38 = arith.mulf %35, %6 : vector<8x256xf32>
    %c8_20 = arith.constant 8 : index
    %c0_21 = arith.constant 0 : index
    %39 = vector.load %arg7[%c8_20, %c0_21] : memref<32x256xf32, #tpu.memory_space<vmem>>, vector<8x256xf32>
    tpu.vector_store %arg7[%c8_20, %c0_21], %38 {strides = array<i32>} : memref<32x256xf32, #tpu.memory_space<vmem>>, vector<8x256xf32>,
    %40 = arith.mulf %35, %7 : vector<8x256xf32>
    %c16_22 = arith.constant 16 : index
    %c0_23 = arith.constant 0 : index
    %41 = vector.load %arg7[%c16_22, %c0_23] : memref<32x256xf32, #tpu.memory_space<vmem>>, vector<8x256xf32>
    tpu.vector_store %arg7[%c16_22, %c0_23], %40 {strides = array<i32>} : memref<32x256xf32, #tpu.memory_space<vmem>>, vector<8x256xf32>,
    %c24_24 = arith.constant 24 : index
    %c0_25 = arith.constant 0 : index
    %42 = vector.load %arg7[%c24_24, %c0_25] : memref<32x256xf32, #tpu.memory_space<vmem>>, vector<8x256xf32>
    tpu.vector_store %arg7[%c24_24, %c0_25], %35 {strides = array<i32>} : memref<32x256xf32, #tpu.memory_space<vmem>>, vector<8x256xf32>,
    %c0_26 = arith.constant 0 : index
    %c0_27 = arith.constant 0 : index
    %c0_28 = arith.constant 0 : index
    %43 = vector.load %arg3[%c0_26, %c0_27, %c0_28] : memref<1x4x32xf32, #tpu.memory_space<vmem>>, vector<1x4x32xf32>
    %44 = vector.shape_cast %43 : vector<1x4x32xf32> to vector<4x32xf32>
    %c0_29 = arith.constant 0 : index
    %c0_30 = arith.constant 0 : index
    %45 = vector.load %arg7[%c0_29, %c0_30] : memref<32x256xf32, #tpu.memory_space<vmem>>, vector<32x256xf32>
    %cst_31 = arith.constant dense<0.000000e+00> : vector<4x256xf32>
    %46 = tpu.matmul %44, %45, %cst_31 {dimension_numbers = #tpu.dot_dimension_numbers<[1], [0], [0], [1], [0, 0, 1, 1], [], []>} : vector<4x32xf32>, vector<32x256xf32>, vector<4x256xf32> -> vector<4x256xf32>
    %c0_32 = arith.constant 0 : index
    %c0_33 = arith.constant 0 : index
    %c0_34 = arith.constant 0 : index
    %47 = vector.load %arg5[%c0_32, %c0_33, %c0_34] : memref<1x4x256xf32, #tpu.memory_space<vmem>>, vector<1x4x256xf32>
    %48 = vector.shape_cast %47 : vector<1x4x256xf32> to vector<4x256xf32>
    %49 = vector.shape_cast %46 : vector<4x256xf32> to vector<1x4x256xf32>
    tpu.vector_store %arg5[%c0_32, %c0_33, %c0_34], %49 {strides = array<i32>} : memref<1x4x256xf32, #tpu.memory_space<vmem>>, vector<1x4x256xf32>,
    return
  }
  func.func @transform_0(%arg0: i32, %arg1: i32) -> (i32, i32, i32) {
    %c0_i32 = arith.constant 0 : i32
    %c0_i32_0 = arith.constant 0 : i32
    %c0_i32_1 = arith.constant 0 : i32
    return %arg1, %c0_i32, %c0_i32_0 : i32, i32, i32
  }
  func.func @transform_1(%arg0: i32, %arg1: i32) -> (i32, i32, i32) {
    %c0_i32 = arith.constant 0 : i32
    %c0_i32_0 = arith.constant 0 : i32
    %c0_i32_1 = arith.constant 0 : i32
    return %arg1, %c0_i32, %c0_i32_0 : i32, i32, i32
  }
  func.func @transform_2(%arg0: i32, %arg1: i32) -> (i32, i32) {
    %c0_i32 = arith.constant 0 : i32
    %c0_i32_0 = arith.constant 0 : i32
    return %c0_i32, %arg0 : i32, i32
  }
  func.func @transform_3(%arg0: i32, %arg1: i32) -> (i32, i32, i32) {
    %c0_i32 = arith.constant 0 : i32
    %c0_i32_0 = arith.constant 0 : i32
    return %arg1, %c0_i32, %arg0 : i32, i32, i32
  }
}

</mosaic_0001>

<bundles_post_ra>
// kernel: tpu_custom_call.1
= control target key start
LH: loop header
LB: loop body
LE: loop exit
PB: predicated region body
PF: predicated region fallthrough
CT: control target
= control target key end

     0   :  { %8 = vsyncpa [#allocation5], 0  ;;  %s990_s0 = inlined_call_operand.vmem [shape: f32[2,32,8], index: 0, kind: input, shape index: {}]   ;;  %s991_s1 = inlined_call_operand.vmem [shape: f32[2,4,32], index: 1, kind: input, shape index: {}]   ;;  %s992_s2 = inlined_call_operand.vmem [shape: f32[8,256], index: 2, kind: input, shape index: {}]   ;;  %s993_s3 = inlined_call_operand.hbm [shape: f32[2,4,256], index: 3, kind: output, shape index: {}]  }
   0x1   :  { %10 = vsyncpa [#allocation5 + $0x1], 0  ;;  %s822_s12 = smov 0   ;;  %s824_s13 = smov 0  }
   0x2   :  { %s826_s14 = smov 0   ;;  %s828_s15 = smov 0  }
   0x3   :  { %s830_s16 = smov 0   ;;  %s832_s17 = smov 0  }
   0x4 LB: > { %s624_s18 = sadd.s32 4294967295, %s796_s17   ;;  %s625_s19 = sadd.s32 4294967294, %s796_s17   ;;  %s796_s17 = sphi %s832_s17, %s16_s17   ;;  %s792_s16 = sphi %s830_s16, %s1004_s16   ;;  %s788_s15 = sphi %s828_s15, %s1003_s15   ;;  %s784_s14 = sphi %s826_s14, %s1002_s14   ;;  %s780_s13 = sphi %s824_s13, %s1001_s13   ;;  %s776_s12 = sphi %s822_s12, %s1000_s12  }
   0x5   : > { %s25_s20 = sadd.s32 1, %s792_s16  ;;  %s115_s21 = sadd.s32 1, %s784_s14 }
   0x6   : > { %p26_p0 = scmp.ge.s32.totalorder %s25_s20, 2  ;;  %p125_p1 = scmp.ne.s32.totalorder %s784_s14, %s780_s13 }
   0x7   : > { %p126_p2 = scmp.eq.s32.totalorder %s624_s18, 1  ;;  %p131_p3 = scmp.ne.s32.totalorder %s780_s13, %s776_s12 }
   0x8   : > { %s1006_s20 = smov (%p26_p0, %s25_s20), 0  ;;  %p132_p5 = scmp.eq.s32.totalorder %s625_s19, 1 }
   0x9   : > { %p862_p4 = por %p126_p2, %p125_p1  ;;  %s110_s23 = ssub.s32 %s792_s16, %s1006_s20 }
   0xa   : > { %p629_p6 = scmp.ge.s32.totalorder %s796_s17, 1  ;;  %p113_p7 = scmp.eq.s32.totalorder %s110_s23, 0 }
   0xb   : > { %p869_p8 = por %p132_p5, %p131_p3  ;;  %p174_p9 = scmp.lt.s32.totalorder %s796_s17, 3 }
   0xc   : > { %s875_s25 = scalar_select %p113_p7, %s784_s14, %s115_s21  }
   0xd   : > { %p175_p10 = pnand %p629_p6, %p174_p9 }
   0xe   : > { %v228_v0 = vld [vmem:[%s992_s2 + $0x8] sm:$0xff] (!%p175_p10)  ;;  %v227_v1 = vld [vmem:[%s992_s2] sm:$0xff] (!%p175_p10)  ;;  %p207_p11 = scmp.lt.s32.totalorder (!%p175_p10), %s788_s15, 1  ;;  %v798_v2 = vmov (!%p175_p10), 0.0   ;;  %vm229_vm0 = vcmask (!%p175_p10), 64512   ;;  %v375_v26 = vlaneseq (!%p175_p10)  ;;  %v799_v57 = vmov (!%p175_p10), 1.0  }
   0xf   : > { %178 = sbr.rel (%p175_p10) target bundleno = 525 (0x20d), region = 32  ;;  %242 = vmatprep.subr.mxu0 (!%p175_p10), %v228_v0  ;;  %306 = vmatprep.mubr.f32.mxu0 (!%p175_p10), %v798_v2  ;;  %s204_s18 = sand.u32 (!%p175_p10), 1, %s780_s13  }
  0x10   : > { %243 = vmatpush1.msra.mxu0 (!%p175_p10), %v227_v1  ;;  %498 = vmatprep.mubr.f32.mxu1 (!%p175_p10), %v798_v2  ;;  %v376_v31 = vshrl.u32 (!%p175_p10), %v375_v26, 7  ;;  %s630_s19 = sshll.u32 (!%p175_p10), %s204_s18, 3  ;;  %s647_s21 = sshll.u32 (!%p175_p10), %s788_s15, 7 }
  0x11   : > { %s206_s23 = scalar_lea.vmem (!%p175_p10), [#allocation4], %s630_s19  ;;  %s943_s29 = scalar_lea.hbm (!%p175_p10), %s993_s3, %s647_s21 }
  0x12   : > { %s527_s26 = sshll.u32 (!%p175_p10), %s206_s23, 4  ;;  %s945_s26 = int_to_ptr.vmem [resolvable:$true] %s527_s26 }
  0x16   : > { %s886_s30 = scalar_select %p207_p11, %s788_s15, 1 }
  0x17   : > { %s801_s15 = smov [#allocation4]  }
  0x18   : > { %s646_s4 = sshll.u32 %s886_s30, 5  ;;  %s633_s8 = sshll.u32 %s886_s30, 2 }
  0x19   : > { %s211_s7 = scalar_lea.vmem %s990_s0, %s646_s4  ;;  %s215_s11 = scalar_lea.vmem %s991_s1, %s633_s8 }
  0x1a   : > { %v223_v3 = vld [vmem:[%s211_s7] sm:$0xff]  ;;  %v224_v4 = vld [vmem:[%s211_s7 + $0x8] sm:$0xff]  ;;  %v225_v5 = vld [vmem:[%s211_s7 + $0x10] sm:$0xff]  ;;  %s511_s30 = scalar_lea.sflag [#allocation5], %s204_s18  ;;  %s718_s4 = scalar_lea.vmem %s945_s26, 128 }
  0x1b   : > { %634 = vmatmul.mubr.msk.f32.vlgmr.msra.gmra.mrb[0].mxu0 %vm229_vm0, %v223_v3  ;;  %v226_v6 = vld [vmem:[%s211_s7 + $0x18] sm:$0xff]  ;;  %v421_v60 = vld [vmem:[%s215_s11] sm:$0xf]  ;;  %p719_p12 = scmp.ne.s32.totalorder %s945_s26, %s718_s4  ;;  %s722_s5 = sshll.u32 %s801_s15, 4  ;;  %s723_s5 = int_to_ptr.vmem [resolvable:$false] %s722_s5 }
  0x1c   : > { %312 = vmatprep.mubr.f32.mxu0 %v798_v2  ;;  %s724_s6 = scalar_lea.vmem %s723_s5, 256  ;;  %p725_p1 = scmp.lt.s32.totalorder %s945_s26, %s723_s5 }
  0x1d   : > { %p720_p13 = pnand %p719_p12, %p862_p4  ;;  %p726_p2 = scmp.lt.s32.totalorder %s724_s6, %s718_s4 }
  0x1f   : > { %635 = vmatmul.mubr.msk.f32.gmra.mrb[2].mxu0 %vm229_vm0, %v224_v4  ;;  %p721_p0 = pneg %p720_p13  ;;  %p727_p3 = por %p726_p2, %p725_p1 }
  0x20   : > { %318 = vmatprep.mubr.f32.mxu0 %v798_v2 }
  0x21   : > { %p728_p5 = pnand %p727_p3, %p721_p0 }
  0x23   : > { %636 = vmatmul.mubr.msk.f32.gmra.mrb[4].mxu0 %vm229_vm0, %v225_v5 }
  0x24   : > { %324 = vmatprep.mubr.f32.mxu0 %v798_v2 }
  0x27   : > { %637 = vmatmul.mubr.msk.f32.gmra.mrb[6].mxu0 %vm229_vm0, %v226_v6 }
  0xee   : > { %v896_v7 = vpop.f32.mrb[0].mxu0 }
  0xef   : > { %v898_v8 = vpop.f32.mrb[1].mxu0  ;;  %vm347_vm1 = vcmp.gt.f32.partialorder %v896_v7, 0.0 }
  0xf0   : > { %vm348_vm3 = vcmp.gt.f32.partialorder %v898_v8, 0.0 }
  0xf2   : > { %v900_v9 = vpop.f32.mrb[2].mxu0 }
  0xf3   : > { %vm349_vm2 = vcmp.gt.f32.partialorder %v900_v9, 0.0  ;;  %v904_v10 = vpop.f32.mrb[3].mxu0 }
  0xf4   : > { %vm351_vm4 = vmand %vm347_vm1, %vm349_vm2  ;;  %vm350_vm5 = vcmp.gt.f32.partialorder %v904_v10, 0.0 }
  0xf5   : > { %vm352_vm6 = vmand %vm348_vm3, %vm350_vm5 }
  0xf6   : > { %v320_v11 = vpop.f32.mrb[4].mxu0 }
  0xf7   : > { %vm353_vm7 = vcmp.gt.f32.partialorder %v320_v11, 0.0  ;;  %v322_v12 = vpop.f32.mrb[5].mxu0 }
  0xf8   : > { %vm355_vm8 = vmand %vm351_vm4, %vm353_vm7  ;;  %vm354_vm9 = vcmp.gt.f32.partialorder %v322_v12, 0.0 }
  0xf9   : > { %vm356_vm10 = vmand %vm352_vm6, %vm354_vm9 }
  0xfa   : > { %v326_v13 = vpop.f32.mrb[6].mxu0 }
  0xfb   : > { %vm357_vm11 = vcmp.ge.f32.partialorder %v326_v13, 0.0  ;;  %v328_v14 = vpop.f32.mrb[7].mxu0 }
  0xfc   : > { %vm908_vm12 = vmand %vm355_vm8, %vm357_vm11  ;;  %vm358_vm13 = vcmp.ge.f32.partialorder %v328_v14, 0.0  ;;  %vm800_vm11 = vmmov 1  }
  0xfd   : > { %v361_v16 = vsel %vm908_vm12, %v326_v13, inf  ;;  %vm914_vm14 = vmand %vm356_vm10, %vm358_vm13 }
  0xfe   : > { %v363_v18 = vrot.slane %v361_v16, 4  ;;  %v362_v19 = vsel %vm914_vm14, %v328_v14, inf }
  0xff   : > { %v369_v20 = vrot.slane %v362_v19, 4 }
 0x100   : > { %v364_v21 = vmin.f32 %v361_v16, %v363_v18 }
 0x101   : > { %v370_v22 = vmin.f32 %v362_v19, %v369_v20 }
 0x102   : > { %v365_v23 = vrot.slane %v364_v21, 2 }
 0x103   : > { %v371_v24 = vrot.slane %v370_v22, 2 }
 0x104   : > { %v366_v25 = vmin.f32 %v364_v21, %v365_v23 }
 0x105   : > { %v372_v27 = vmin.f32 %v370_v22, %v371_v24 }
 0x106   : > { %v367_v28 = vrot.slane %v366_v25, 1 }
 0x107   : > { %v373_v29 = vrot.slane %v372_v27, 1 }
 0x108   : > { %v368_v30 = vmin.f32 %v366_v25, %v367_v28 }
 0x109   : > { %v374_v32 = vmin.f32 %v372_v27, %v373_v29 }
 0x10a   : > { %vm377_vm15 = vcmp.eq.f32.partialorder %v361_v16, %v368_v30 }
 0x10b   : > { %vm379_vm0 = vmand %vm908_vm12, %vm377_vm15  ;;  %vm378_vm1 = vcmp.eq.f32.partialorder %v362_v19, %v374_v32 }
 0x10c   : > { %v381_v33 = vsel %vm379_vm0, %v376_v31, 8  ;;  %vm380_vm2 = vmand %vm914_vm14, %vm378_vm1  ;;  %vm430_vm14 = vcmask 261120  }
 0x10d   : > { %v383_v34 = vrot.slane %v381_v33, 4  ;;  %v382_v35 = vsel %vm380_vm2, %v376_v31, 8 }
 0x10e   : > { %v392_v36 = vrot.slane %v382_v35, 4 }
 0x10f   : > { %vm384_vm3 = vcmp.lt.s32.totalorder %v381_v33, %v383_v34 }
 0x110   : > { %v385_v37 = vsel %vm384_vm3, %v381_v33, %v383_v34  ;;  %vm393_vm4 = vcmp.lt.s32.totalorder %v382_v35, %v392_v36 }
 0x111   : > { %v386_v38 = vrot.slane %v385_v37, 2  ;;  %v394_v39 = vsel %vm393_vm4, %v382_v35, %v392_v36 }
 0x112   : > { %v395_v40 = vrot.slane %v394_v39, 2 }
 0x113   : > { %vm387_vm5 = vcmp.lt.s32.totalorder %v385_v37, %v386_v38 }
 0x114   : > { %v388_v41 = vsel %vm387_vm5, %v385_v37, %v386_v38  ;;  %vm396_vm6 = vcmp.lt.s32.totalorder %v394_v39, %v395_v40 }
 0x115   : > { %v389_v42 = vrot.slane %v388_v41, 1  ;;  %v397_v43 = vsel %vm396_vm6, %v394_v39, %v395_v40 }
 0x116   : > { %v398_v44 = vrot.slane %v397_v43, 1 }
 0x117   : > { %vm390_vm7 = vcmp.lt.s32.totalorder %v388_v41, %v389_v42 }
 0x118   : > { %vm399_vm8 = vcmp.lt.s32.totalorder %v397_v43, %v398_v44  ;;  %v391_v45 = vsel %vm390_vm7, %v388_v41, %v389_v42 }
 0x119   : > { %v400_v46 = vsel %vm399_vm8, %v397_v43, %v398_v44  ;;  %vm401_vm9 = vcmp.eq.s32.totalorder %v376_v31, %v391_v45 }
 0x11a   : > { %vm402_vm10 = vcmp.eq.s32.totalorder %v376_v31, %v400_v46  ;;  %v638_v47 = vsel %vm401_vm9, 1.0, %v798_v2  ;;  %vm658_vm13 = vmpackc.low %vm401_vm9, %vm800_vm11 }
 0x11b   : > { %v639_v48 = vsel %vm402_vm10, 1.0, %v798_v2  ;;  %v407_v49 = vmul.f32 %v638_v47, %v896_v7  ;;  %v411_v50 = vmul.f32 %v638_v47, %v900_v9  ;;  %v415_v51 = vmul.f32 %v638_v47, %v320_v11  ;;  %vm655_vm12 = vmpackc.low %vm402_vm10, %vm800_vm11 }
 0x11c   : > { %v408_v52 = vmul.f32 %v639_v48, %v898_v8  ;;  %v412_v53 = vmul.f32 %v639_v48, %v904_v10  ;;  %v416_v54 = vmul.f32 %v639_v48, %v322_v12 }
 0x11d   : > { %v652_v55 = vpack.c.bf16 %v411_v50, %v407_v49  ;;  %v657_v59 = vpack.c.bf16 %v799_v57, %v415_v51 }
 0x11e   : > { %v650_v56 = vpack.c.bf16 %v412_v53, %v408_v52  ;;  %v654_v58 = vpack.c.bf16 %v799_v57, %v416_v54 }
 0x120   : > { %651 = vmatprep.subr.bf16.mxu1 %v650_v56 }
 0x121   : > { %653 = vmatpush1.bf16.msra.mxu1 %v652_v55 }
 0x122   : > { %656 = vmatprep.subr.msk.bf16.mxu1 %vm655_vm12, %v654_v58 }
 0x125   : > { %659 = vmatpush1.bf16.msk.msra.mxu1 %vm658_vm13, %v657_v59 }
 0x128   : > { %640 = vmatmul.mubr.msk.f32.vlgmr.msra.gmra.mrb[0].mxu1 %vm430_vm14, %v421_v60 }
 0x1fb   : > { %v500_v61 = vpop.f32.mrb[0].mxu1 }
 0x1fc   : > { %v502_v62 = vpop.f32.mrb[1].mxu1 }
 0x1fd   : > { %v507_v63 = vcombine.low %v500_v61, %v502_v62 }
 0x1ff   : > { %509 = vst [vmem:[%s206_s23] sm:$0xff] %v507_v63 }
 0x200   : > { %731 = shalt.err (!%p728_p5)
}
 0x201   : > { %s732_s7 = scalar_lea.hbm %s943_s29, 128  ;;  %s736_s10 = scalar_lea.hbm %s993_s3, 256 }
 0x202   : > { %p733_p6 = scmp.ne.s32.totalorder %s943_s29, %s732_s7  ;;  %p737_p10 = scmp.lt.u32.totalorder %s943_s29, %s993_s3 }
 0x203   : > { %p738_p11 = scmp.lt.u32.totalorder %s736_s10, %s732_s7  ;;  %p740_p13 = scmp.lt.u32.totalorder %s732_s7, %s943_s29 }
 0x204   : > { %p734_p7 = pnand %p733_p6, %p862_p4 }
 0x205   : > { %p739_p12 = por %p738_p11, %p737_p10 }
 0x206   : > { %p735_p9 = pneg %p734_p7 }
 0x207   : > { %p741_p0 = por %p740_p13, %p739_p12 }
 0x209   : > { %p742_p1 = pnand %p741_p0, %p735_p9 }
 0x20b   : > { %745 = shalt.err (!%p742_p1)
}
 0x20c   : > { %660 = dma.vmem_to_hbm [thread:$0]  (%p862_p4), %s945_s26, 128, %s943_s29, %s511_s30  }
 0x20d PF: > { %p666_p2 = scmp.ge.s32.totalorder %s796_s17, 2  ;;  %s539_s19 = sand.u32 1, %s776_s12  }
 0x20e   : > { %s540_s21 = scalar_lea.sflag [#allocation5], %s539_s19 }
 0x20f   : > { %p663_p3 = pnand %p666_p2, %p869_p8 }
 0x211   : > { %771 = dma.done.wait (!%p663_p3), %s540_s21, 128  }
 0x212   : > { %773 = vsyncadd (!%p663_p3), %s540_s21, 4294967168  ;;  %s16_s17 = sadd.s32 1, %s796_s17   ;;  %s1000_s12 = smov %s780_s13 }
 0x213   : > { %p13_p5 = scmp.ge.s32.totalorder %s16_s17, 4   ;;  %s1001_s13 = smov %s784_s14 }
 0x214   : > { %s1002_s14 = smov %s875_s25  ;;  %s1003_s15 = smov %s792_s16 }
 0x215   : > { %s1004_s16 = smov %s1006_s20  ;;  %15 = sbr.rel (!%p13_p5) target bundleno = 4 (0x4), region = 73 }
 0x21c   :  { %545 = vsyncpa [#allocation5], 1 }
 0x21d   :  { %547 = vsyncpa [#allocation5 + $0x1], 1 }

</bundles_post_ra>
